<compile_context>
chip_gen: v5e
topology: v5e:2x2
jax: 0.10.0
libtpu: 0.0.40
codegen_flags: <defaults>
</compile_context>

<pallas_src>
import jax
import jax.numpy as jnp
from jax.experimental import pallas as pl
from jax.experimental.pallas import tpu as pltpu


def _inject_kernel(gate_ref, x_ref, c_ref, o_ref):
    # gate_ref: (1,) scalar in SMEM; x_ref, c_ref, o_ref: (TR, L) tiles in VMEM.
    g = gate_ref[0]
    o_ref[...] = x_ref[...] * g + c_ref[...]


_LANE_WIDTHS = (4096, 2048, 1024, 512, 256, 128)


def _choose_2d_layout(total):
    """Pick (rows, lanes) with lanes a big multiple of 128, rows % 8 == 0 if possible."""
    for lanes in _LANE_WIDTHS:
        if total % lanes == 0 and (total // lanes) % 8 == 0:
            return total // lanes, lanes
    for lanes in _LANE_WIDTHS:
        if total % lanes == 0:
            return total // lanes, lanes
    return None


def _pick_row_tile(rows, row_bytes, max_block_bytes):
    """Largest multiple-of-8 divisor of `rows` whose block stays under the byte budget."""
    if rows <= 8:
        return rows
    max_rows = max(8, max_block_bytes // row_bytes)
    if rows <= max_rows:
        return rows
    cand = (max_rows // 8) * 8
    while cand >= 8:
        if rows % cand == 0:
            return cand
        cand -= 8
    # No clean multiple-of-8 divisor: fall back to a single full-array block.
    return rows


def output_injector(x_input, x, c, gate, tau=1.0, max_block_bytes=2 * 1024 * 1024):
    """JAX/Pallas equivalent of Output_injector.forward.

    x_input and tau are unused by the reference forward (kept for signature parity).
    x, c: same NCHW shape. gate: scalar parameter.
    """
    del x_input, tau
    orig_shape = x.shape
    orig_dtype = x.dtype
    total = x.size

    gate_arr = jnp.asarray(gate, dtype=orig_dtype).reshape((1,))

    layout = _choose_2d_layout(total)
    trim = 0
    if layout is None:
        # Fallback for sizes not divisible by 128: pad the flat array up to a
        # multiple of 8*512 so the slab is (rows%8==0, 512 lanes), slice after.
        # TODO(synk): padded path adds an XLA pad+slice around the kernel.
        padded = ((total + 4095) // 4096) * 4096
        trim = padded - total
        xf = jnp.pad(x.reshape(-1), (0, trim))
        cf = jnp.pad(c.reshape(-1), (0, trim))
        rows, lanes = padded // 512, 512
        x2 = xf.reshape(rows, lanes)
        c2 = cf.reshape(rows, lanes)
    else:
        rows, lanes = layout
        x2 = x.reshape(rows, lanes)
        c2 = c.reshape(rows, lanes)

    row_bytes = lanes * x.dtype.itemsize
    tr = _pick_row_tile(rows, row_bytes, max_block_bytes)
    grid_r = rows // tr

    if grid_r <= 1:
        # Tiny / single-block case: no grid, whole slab resident in VMEM.
        out2 = pl.pallas_call(
            _inject_kernel,
            out_shape=jax.ShapeDtypeStruct((rows, lanes), orig_dtype),
            in_specs=[
                pl.BlockSpec(memory_space=pltpu.SMEM),   # gate scalar
                pl.BlockSpec(memory_space=pltpu.VMEM),   # x slab
                pl.BlockSpec(memory_space=pltpu.VMEM),   # c slab
            ],
            out_specs=pl.BlockSpec(memory_space=pltpu.VMEM),
            input_output_aliases={1: 0},                  # out aliases x
        )(gate_arr, x2, c2)
    else:
        # Tiled, pipelined path: double-buffered DMA overlaps the VPU FMA;
        # "parallel" lets v7x shard rows across both TensorCores.
        # (If a trace ever shows exposed DMA on v7x, add
        #  pipeline_mode=pl.Buffered(3) to the x/c BlockSpecs.)
        out2 = pl.pallas_call(
            _inject_kernel,
            out_shape=jax.ShapeDtypeStruct((rows, lanes), orig_dtype),
            grid=(grid_r,),
            in_specs=[
                pl.BlockSpec(memory_space=pltpu.SMEM),              # gate scalar
                pl.BlockSpec((tr, lanes), lambda i: (i, 0)),        # x tile
                pl.BlockSpec((tr, lanes), lambda i: (i, 0)),        # c tile
            ],
            out_specs=pl.BlockSpec((tr, lanes), lambda i: (i, 0)),
            compiler_params=pltpu.CompilerParams(
                dimension_semantics=("parallel",),
            ),
            input_output_aliases={1: 0},                             # out aliases x
        )(gate_arr, x2, c2)

    if trim:
        out2 = out2.reshape(-1)[:total]
    return out2.reshape(orig_shape)


if __name__ == "__main__":
    key = jax.random.PRNGKey(0)
    k1, k2, k3, k4, k5 = jax.random.split(key, 5)

    # Small NCHW shape consistent with the module's usage (grid-less path).
    N, C, H, W = 2, 4, 16, 16
    x_input = jax.random.normal(k1, (N, C, H, W), dtype=jnp.float32)  # unused by forward
    x = jax.random.normal(k2, (N, C, H, W), dtype=jnp.float32)
    c = jax.random.normal(k3, (N, C, H, W), dtype=jnp.float32)

    # start_value=0.0 by default in the module; use 0.5 so the gate path is exercised.
    gate = jnp.float32(0.5)

    out = output_injector(x_input, x, c, gate, tau=1.0)
    out = jax.block_until_ready(out)
    ref = x * gate + c
    assert out.shape == x.shape
    assert jnp.allclose(out, ref, atol=1e-6), "mismatch vs reference (small case)"

    # Moderately larger input pushed through the tiled / pipelined path
    # (grid > 1, "parallel" row axis) by shrinking the per-block byte budget.
    xb = jax.random.normal(k4, (2, 8, 64, 128), dtype=jnp.float32)
    cb = jax.random.normal(k5, (2, 8, 64, 128), dtype=jnp.float32)
    outb = output_injector(None, xb, cb, gate, max_block_bytes=64 * 1024)
    outb = jax.block_until_ready(outb)
    refb = xb * gate + cb
    assert outb.shape == xb.shape
    assert jnp.allclose(outb, refb, atol=1e-6), "mismatch vs reference (tiled case)"

    print("KERNEL_OK")
</pallas_src>

<mosaic_0001>
module attributes {stable_mosaic.version = 11 : i64} {
  func.func @_inject_kernel(%arg0: memref<1xf32, #tpu.memory_space<smem>>, %arg1: memref<8x256xf32, #tpu.memory_space<vmem>>, %arg2: memref<8x256xf32, #tpu.memory_space<vmem>>, %arg3: memref<8x256xf32, #tpu.memory_space<vmem>>) attributes {dimension_semantics = [], scalar_prefetch = 0 : i64, scratch_operands = 0 : i64, tpu.core_type = #tpu.core_type<tc>} {
    %c0 = arith.constant 0 : index
    %0 = memref.load %arg0[%c0] : memref<1xf32, #tpu.memory_space<smem>>
    %c0_0 = arith.constant 0 : index
    %c0_1 = arith.constant 0 : index
    %1 = vector.load %arg1[%c0_0, %c0_1] : memref<8x256xf32, #tpu.memory_space<vmem>>, vector<8x256xf32>
    %2 = vector.broadcast %0 : f32 to vector<8x256xf32>
    %3 = arith.mulf %1, %2 : vector<8x256xf32>
    %c0_2 = arith.constant 0 : index
    %c0_3 = arith.constant 0 : index
    %4 = vector.load %arg2[%c0_2, %c0_3] : memref<8x256xf32, #tpu.memory_space<vmem>>, vector<8x256xf32>
    %5 = arith.addf %3, %4 : vector<8x256xf32>
    %c0_4 = arith.constant 0 : index
    %c0_5 = arith.constant 0 : index
    %6 = vector.load %arg3[%c0_4, %c0_5] : memref<8x256xf32, #tpu.memory_space<vmem>>, vector<8x256xf32>
    tpu.vector_store %arg3[%c0_4, %c0_5], %5 {strides = array<i32>} : memref<8x256xf32, #tpu.memory_space<vmem>>, vector<8x256xf32>,
    return
  }
}

</mosaic_0001>

<bundles_post_ra>
// kernel: tpu_custom_call.1
= control target key start
LH: loop header
LB: loop body
LE: loop exit
PB: predicated region body
PF: predicated region fallthrough
CT: control target
= control target key end

     0   :  { %9 = vsyncpa [#allocation4], 0  ;;  %s150_s0 = inlined_call_operand.<no memory space> [shape: f32[1], index: 0, kind: input, shape index: {}]   ;;  %s151_s1 = inlined_call_operand.hbm [shape: f32[8,256], index: 1, kind: input, shape index: {}, may-alias: {1,3}]   ;;  %s152_s2 = inlined_call_operand.vmem [shape: f32[8,256], index: 2, kind: input, shape index: {}]   ;;  %s153_s3 = inlined_call_operand.hbm [shape: f32[8,256], index: 3, kind: output, shape index: {}, may-alias: {1,3}]  }
   0x1   :  { %10 = vsyncpa [#allocation5], 0  ;;  %s18_s14 = sshll.u32 %s151_s1, 4  ;;  %s113_s15 = smov [#allocation3]   ;;  %s19_s14 = int_to_ptr.hbm [resolvable:$true] %s18_s14 }
   0x2   :  { %s20_s16 = sshll.u32 %s113_s15, 4  ;;  %s21_s16 = int_to_ptr.vmem [resolvable:$true] %s20_s16 }
   0x3   :  { %23 = dma.hbm_to_vmem [thread:$0]  %s19_s14, 256, %s21_s16, [#allocation4]  }
   0x4   :  { %109 = dma.done.wait [#allocation4], 256  }
   0x5   :  { %110 = vsyncadd [#allocation4], 4294967040  ;;  %v33_v0 = vstv %s150_s0  ;;  %v31_v1 = vld [vmem:[#allocation3] sm:$0xff]  ;;  %v32_v3 = vld [vmem:[#allocation3 + $0x8] sm:$0xff]  ;;  %s114_s22 = smov [#allocation6]   ;;  %s49_s26 = sshll.u32 %s153_s3, 4  ;;  %s50_s26 = int_to_ptr.hbm [resolvable:$true] %s49_s26 }
   0x6   :  { %v36_v2 = vld [vmem:[%s152_s2] sm:$0xff]  ;;  %v34_v4 = vmul.f32 %v33_v0, %v31_v1  ;;  %v35_v5 = vmul.f32 %v33_v0, %v32_v3  ;;  %v37_v6 = vld [vmem:[%s152_s2 + $0x8] sm:$0xff]  ;;  %s47_s23 = sshll.u32 %s114_s22, 4  ;;  %s48_s23 = int_to_ptr.vmem [resolvable:$true] %s47_s23 }
   0x8   :  { %v38_v7 = vadd.f32 %v36_v2, %v34_v4  ;;  %v39_v8 = vadd.f32 %v37_v6, %v35_v5 }
   0xa   :  { %40 = vst [vmem:[#allocation6] sm:$0xff] %v38_v7 }
   0xb   :  { %41 = vst [vmem:[#allocation6 + $0x8] sm:$0xff] %v39_v8 }
   0xc   :  { %52 = dma.vmem_to_hbm [thread:$0]  %s48_s23, 256, %s50_s26, [#allocation5]  }
   0xd   :  { %111 = dma.done.wait [#allocation5], 256  }
   0xe   :  { %112 = vsyncadd [#allocation5], 4294967040 }
   0xf   :  { %57 = vsyncpa [#allocation4], 1 }
  0x10   :  { %58 = vsyncpa [#allocation5], 1 }

</bundles_post_ra>
